<compile_context>
chip_gen: v7x
topology: tpu7x:2x2x1
jax: 0.10.0
libtpu: 0.0.40
codegen_flags: <defaults>
</compile_context>

<pallas_src>
import functools
from typing import NamedTuple

import jax
import jax.numpy as jnp
from jax.experimental import pallas as pl
from jax.experimental.pallas import tpu as pltpu


_VMEM_BUDGET = 32 * 1024 * 1024  # shrink tile_b if estimate exceeds this


def _round_up(x, m):
    return (x + m - 1) // m * m


class _Meta(NamedTuple):
    num_actions: int
    state_dim: int
    hidden1: int      # per-head layer-1 width, padded to 128 lanes
    hidden2: int      # layer-2 width, padded to 128 lanes
    out_width: int    # lane width of the kernel output slab
    a_pad: int        # per-segment width for the wide-action fallback
    packed_out: bool  # True -> q|log_bc|bc packed into one 128-lane block


# --------------------------------------------------------------------------
# Kernel
# --------------------------------------------------------------------------
def _bqnet_kernel(meta,
                  x_ref, w1_ref, b1_ref,
                  w2q_ref, b2q_ref, w3q_ref, b3q_ref,
                  w2g_ref, b2g_ref, w3g_ref, b3g_ref,
                  out_ref):
    A = meta.num_actions
    h1_w = meta.hidden1

    # ---- Layer 1, fused across the Q and G heads: one bf16 MXU dot, f32 acc.
    h = jnp.dot(x_ref[...], w1_ref[...], preferred_element_type=jnp.float32) + b1_ref[...]
    h = jnp.maximum(h, 0.0)
    h_q = h[:, :h1_w]          # lane-aligned static split (hidden1 padded to 128)
    h_g = h[:, h1_w:]

    def hidden(h0, w_ref, b_ref):
        y = jnp.dot(h0.astype(jnp.bfloat16), w_ref[...],
                    preferred_element_type=jnp.float32) + b_ref[...]
        return jnp.maximum(y, 0.0)

    def final(h0, w_ref, b_ref):
        return jnp.dot(h0.astype(jnp.bfloat16), w_ref[...],
                       preferred_element_type=jnp.float32) + b_ref[...]

    q = final(hidden(h_q, w2q_ref, b2q_ref), w3q_ref, b3q_ref)   # [tile_b, out_w]
    g = final(hidden(h_g, w2g_ref, b2g_ref), w3g_ref, b3g_ref)   # [tile_b, out_w]

    col = jax.lax.broadcasted_iota(jnp.int32, g.shape, 1)

    if meta.packed_out:
        # w3g was packed so bc sits in lanes [A:2A] and is duplicated in
        # [2A:3A]; q sits in lanes [0:A] (zeros elsewhere).  log_softmax over
        # the [A:2A] copy, then a single unmasked 128-lane store of
        # [q | log_softmax(bc) | bc].
        valid = (col >= A) & (col < 2 * A)
        m = jnp.max(jnp.where(valid, g, -jnp.inf), axis=1, keepdims=True)
        z = g - m
        lse = jnp.log(jnp.sum(jnp.exp(jnp.where(valid, z, -jnp.inf)),
                              axis=1, keepdims=True))
        log_bc = z - lse
        out = jnp.where(col < A, q, jnp.where(col < 2 * A, log_bc, g))
        out_ref[...] = out.astype(out_ref.dtype)
    else:
        # Wide-action fallback: [q | log_softmax(bc) | bc], each a_pad lanes.
        a_pad = meta.a_pad
        valid = col < A
        m = jnp.max(jnp.where(valid, g, -jnp.inf), axis=1, keepdims=True)
        z = g - m
        lse = jnp.log(jnp.sum(jnp.exp(jnp.where(valid, z, -jnp.inf)),
                              axis=1, keepdims=True))
        log_bc = z - lse
        out_ref[:, 0:a_pad] = q.astype(out_ref.dtype)
        out_ref[:, a_pad:2 * a_pad] = log_bc.astype(out_ref.dtype)
        out_ref[:, 2 * a_pad:3 * a_pad] = g.astype(out_ref.dtype)


# --------------------------------------------------------------------------
# One-time parameter repacking (hoisted out of the per-call path)
# --------------------------------------------------------------------------
def pack_params(params):
    """Repack the raw parameter dict into the kernel layout.  Call ONCE."""
    f32 = jnp.float32
    q_w1, g_w1 = params["q_w1"], params["g_w1"]
    q_w2, g_w2 = params["q_w2"], params["g_w2"]
    q_w3, g_w3 = params["q_w3"], params["g_w3"]
    D = q_w1.shape[0]
    h1_raw, h2_raw, A = q_w1.shape[1], q_w2.shape[1], q_w3.shape[1]
    assert (g_w1.shape == q_w1.shape and g_w2.shape == q_w2.shape
            and g_w3.shape == q_w3.shape), \
        "Q and G heads must share layer shapes for the fused layer-1 trick"

    h1 = _round_up(h1_raw, 128)    # lane-align the fused layer-1 split point
    h2 = _round_up(h2_raw, 128)
    packed_out = 3 * A <= 128
    a_pad = _round_up(A, 128)
    out_w = 128 if packed_out else 3 * a_pad

    def pad_to(w, rows, cols):
        return jnp.pad(w, ((0, rows - w.shape[0]), (0, cols - w.shape[1])))

    # Fused layer 1 (both heads read the same state): [D, 2*h1].
    w1 = jnp.concatenate([pad_to(q_w1, D, h1), pad_to(g_w1, D, h1)], axis=1)
    b1 = jnp.concatenate([pad_to(params["q_b1"], 1, h1),
                          pad_to(params["g_b1"], 1, h1)], axis=1)
    # Layer 2 per head: [h1, h2].
    w2q = pad_to(q_w2, h1, h2)
    b2q = pad_to(params["q_b2"], 1, h2)
    w2g = pad_to(g_w2, h1, h2)
    b2g = pad_to(params["g_b2"], 1, h2)

    if packed_out:
        # Lay the final layer out so the output slab needs no cross-lane moves:
        #   q  -> lanes [0:A];  bc -> lanes [A:2A] AND duplicated at [2A:3A].
        w3q = jnp.zeros((h2, out_w), f32).at[:h2_raw, 0:A].set(q_w3)
        b3q = jnp.zeros((1, out_w), f32).at[:, 0:A].set(params["q_b3"])
        w3g = (jnp.zeros((h2, out_w), f32)
               .at[:h2_raw, A:2 * A].set(g_w3)
               .at[:h2_raw, 2 * A:3 * A].set(g_w3))
        b3g = (jnp.zeros((1, out_w), f32)
               .at[:, A:2 * A].set(params["g_b3"])
               .at[:, 2 * A:3 * A].set(params["g_b3"]))
    else:
        w3q = pad_to(q_w3, h2, a_pad)
        b3q = pad_to(params["q_b3"], 1, a_pad)
        w3g = pad_to(g_w3, h2, a_pad)
        b3g = pad_to(params["g_b3"], 1, a_pad)

    packed = {
        "w1": w1.astype(jnp.bfloat16), "b1": b1.astype(f32),
        "w2q": w2q.astype(jnp.bfloat16), "b2q": b2q.astype(f32),
        "w2g": w2g.astype(jnp.bfloat16), "b2g": b2g.astype(f32),
        "w3q": w3q.astype(jnp.bfloat16), "b3q": b3q.astype(f32),
        "w3g": w3g.astype(jnp.bfloat16), "b3g": b3g.astype(f32),
    }
    meta = _Meta(num_actions=A, state_dim=D, hidden1=h1, hidden2=h2,
                 out_width=out_w, a_pad=a_pad, packed_out=packed_out)
    return packed, meta


def _vmem_bytes(tile_b, d, meta, packed):
    total = 2 * tile_b * d * 2                      # x tile (bf16), double-buffered
    total += 2 * tile_b * meta.out_width * 4        # out tile (f32), double-buffered
    total += sum(2 * int(a.size) * a.dtype.itemsize for a in packed.values())
    # f32 intermediates: fused layer-1, two hidden activations, head outputs.
    total += 4 * tile_b * (2 * meta.hidden1 + 2 * meta.hidden2 + 4 * meta.out_width)
    return total


# --------------------------------------------------------------------------
# Wrapper
# --------------------------------------------------------------------------
def behavior_q_network_forward(state, packed, *, meta, tile_b=256):
    """Forward pass.  `packed`/`meta` come from `pack_params` (one-time)."""
    B, D = state.shape
    assert D == meta.state_dim == packed["w1"].shape[0]
    A = meta.num_actions
    out_w = meta.out_width

    x = state.astype(jnp.bfloat16)   # bf16 state tile: half the HBM->VMEM bytes

    # Batch tiling: even split; >=2 grid steps when B allows so both v7x
    # TensorCores get work; shrink the tile if the VMEM estimate overshoots.
    n_tiles = max(2 if B >= 16 else 1, pl.cdiv(B, tile_b))
    tile_b = _round_up(pl.cdiv(B, n_tiles), 8)
    while tile_b > 8 and _vmem_bytes(tile_b, D, meta, packed) > _VMEM_BUDGET:
        tile_b = _round_up(tile_b // 2, 8)
    n_tiles = pl.cdiv(B, tile_b)
    b_pad = n_tiles * tile_b
    if b_pad != B:
        x = jnp.pad(x, ((0, b_pad - B), (0, 0)))

    def resident(arr):
        # Same block every grid step -> weights are DMA'd once.
        return pl.BlockSpec(arr.shape, lambda i: (0, 0))

    order = ("w1", "b1", "w2q", "b2q", "w3q", "b3q", "w2g", "b2g", "w3g", "b3g")
    weights = [packed[k] for k in order]

    in_specs = [pl.BlockSpec((tile_b, D), lambda i: (i, 0))] + [resident(w) for w in weights]
    out_spec = pl.BlockSpec((tile_b, out_w), lambda i: (i, 0))

    flops = 2 * b_pad * (D * 2 * meta.hidden1
                         + 2 * meta.hidden1 * meta.hidden2
                         + 2 * meta.hidden2 * out_w)
    bytes_accessed = (b_pad * D * 2
                      + sum(int(w.size) * w.dtype.itemsize for w in weights)
                      + b_pad * out_w * 4)
    cost = pl.CostEstimate(flops=int(flops),
                           transcendentals=int(b_pad * (A + 1)),
                           bytes_accessed=int(bytes_accessed))

    vmem_limit = int(min(56 * 2**20,
                         max(32 * 2**20, 1.5 * _vmem_bytes(tile_b, D, meta, packed))))

    out = pl.pallas_call(
        functools.partial(_bqnet_kernel, meta),
        out_shape=jax.ShapeDtypeStruct((b_pad, out_w), jnp.float32),
        grid=(n_tiles,),
        in_specs=in_specs,
        out_specs=out_spec,
        compiler_params=pltpu.CompilerParams(
            dimension_semantics=("parallel",),
            vmem_limit_bytes=vmem_limit),
        cost_estimate=cost,
    )(x, *weights)

    if meta.packed_out:
        q = out[:B, 0:A]
        log_bc = out[:B, A:2 * A]
        bc = out[:B, 2 * A:3 * A]
    else:
        a_pad = meta.a_pad
        q = out[:B, 0:A]
        log_bc = out[:B, a_pad:a_pad + A]
        bc = out[:B, 2 * a_pad:2 * a_pad + A]
    return q, log_bc, bc


# --------------------------------------------------------------------------
# Init + reference (for the self-check)
# --------------------------------------------------------------------------
def init_params(key, input_dim, output_dim, hidden_sizes=(256, 256)):
    """Xavier-normal weights, zero biases (matches the PyTorch __init__)."""
    sizes = [input_dim] + list(hidden_sizes) + [output_dim]
    params = {}
    keys = jax.random.split(key, 2 * (len(sizes) - 1))
    ki = 0
    for prefix in ("q", "g"):
        for li in range(len(sizes) - 1):
            fan_in, fan_out = sizes[li], sizes[li + 1]
            std = (2.0 / (fan_in + fan_out)) ** 0.5
            w = std * jax.random.normal(keys[ki], (fan_in, fan_out), jnp.float32)
            ki += 1
            params[f"{prefix}_w{li + 1}"] = w
            params[f"{prefix}_b{li + 1}"] = jnp.zeros((1, fan_out), jnp.float32)
    return params


def _reference_forward(state, params):
    def mlp(p):
        h = jnp.maximum(state @ params[f"{p}_w1"] + params[f"{p}_b1"], 0.0)
        h = jnp.maximum(h @ params[f"{p}_w2"] + params[f"{p}_b2"], 0.0)
        return h @ params[f"{p}_w3"] + params[f"{p}_b3"]

    q = mlp("q")
    bc = mlp("g")
    return q, jax.nn.log_softmax(bc, axis=1), bc


if __name__ == "__main__":
    # Small shapes consistent with the module (state_dim -> hidden -> num_actions).
    batch = 8
    input_dim = 32
    hidden_sizes = (128, 128)
    num_actions = 16

    key = jax.random.PRNGKey(0)
    pkey, xkey = jax.random.split(key)
    params = init_params(pkey, input_dim, num_actions, hidden_sizes)
    state = jax.random.normal(xkey, (batch, input_dim), jnp.float32)

    packed, meta = pack_params(params)            # one-time, outside the hot path
    fwd = jax.jit(functools.partial(behavior_q_network_forward, meta=meta))

    q, log_bc, bc = fwd(state, packed)
    jax.block_until_ready((q, log_bc, bc))

    # Sanity check against a pure-JAX f32 reference (bf16 matmuls -> looser tol).
    q_ref, log_bc_ref, bc_ref = _reference_forward(state, params)
    assert q.shape == (batch, num_actions)
    assert jnp.allclose(q, q_ref, atol=3e-2, rtol=3e-2)
    assert jnp.allclose(bc, bc_ref, atol=3e-2, rtol=3e-2)
    assert jnp.allclose(log_bc, log_bc_ref, atol=3e-2, rtol=3e-2)

    print("KERNEL_OK")
</pallas_src>

<mosaic_0001>
module attributes {stable_mosaic.version = 11 : i64} {
  func.func @_bqnet_kernel(%arg0: i32, %arg1: memref<8x32xbf16, #tpu.memory_space<vmem>>, %arg2: memref<32x256xbf16, #tpu.memory_space<vmem>>, %arg3: memref<1x256xf32, #tpu.memory_space<vmem>>, %arg4: memref<128x128xbf16, #tpu.memory_space<vmem>>, %arg5: memref<1x128xf32, #tpu.memory_space<vmem>>, %arg6: memref<128x128xbf16, #tpu.memory_space<vmem>>, %arg7: memref<1x128xf32, #tpu.memory_space<vmem>>, %arg8: memref<128x128xbf16, #tpu.memory_space<vmem>>, %arg9: memref<1x128xf32, #tpu.memory_space<vmem>>, %arg10: memref<128x128xbf16, #tpu.memory_space<vmem>>, %arg11: memref<1x128xf32, #tpu.memory_space<vmem>>, %arg12: memref<8x128xf32, #tpu.memory_space<vmem>>) attributes {dimension_semantics = [#tpu.dimension_semantics<parallel>], iteration_bounds = array<i64: 1>, scalar_prefetch = 0 : i64, scratch_operands = 0 : i64, tpu.core_type = #tpu.core_type<tc>, window_params = [{transform_indices = @transform_0, window_bounds = array<i64: 8, 32>}, {pipeline_mode = #tpu.pipeline_mode<synchronous>, transform_indices = @transform_1, window_bounds = array<i64: 32, 256>}, {pipeline_mode = #tpu.pipeline_mode<synchronous>, transform_indices = @transform_2, window_bounds = array<i64: 1, 256>}, {pipeline_mode = #tpu.pipeline_mode<synchronous>, transform_indices = @transform_3, window_bounds = array<i64: 128, 128>}, {pipeline_mode = #tpu.pipeline_mode<synchronous>, transform_indices = @transform_4, window_bounds = array<i64: 1, 128>}, {pipeline_mode = #tpu.pipeline_mode<synchronous>, transform_indices = @transform_5, window_bounds = array<i64: 128, 128>}, {pipeline_mode = #tpu.pipeline_mode<synchronous>, transform_indices = @transform_6, window_bounds = array<i64: 1, 128>}, {pipeline_mode = #tpu.pipeline_mode<synchronous>, transform_indices = @transform_7, window_bounds = array<i64: 128, 128>}, {pipeline_mode = #tpu.pipeline_mode<synchronous>, transform_indices = @transform_8, window_bounds = array<i64: 1, 128>}, {pipeline_mode = #tpu.pipeline_mode<synchronous>, transform_indices = @transform_9, window_bounds = array<i64: 128, 128>}, {pipeline_mode = #tpu.pipeline_mode<synchronous>, transform_indices = @transform_10, window_bounds = array<i64: 1, 128>}, {transform_indices = @transform_11, window_bounds = array<i64: 8, 128>}]} {
    %c0 = arith.constant 0 : index
    %c0_0 = arith.constant 0 : index
    %0 = vector.load %arg1[%c0, %c0_0] : memref<8x32xbf16, #tpu.memory_space<vmem>>, vector<8x32xbf16>
    %c0_1 = arith.constant 0 : index
    %c0_2 = arith.constant 0 : index
    %1 = vector.load %arg2[%c0_1, %c0_2] : memref<32x256xbf16, #tpu.memory_space<vmem>>, vector<32x256xbf16>
    %cst = arith.constant dense<0.000000e+00> : vector<8x256xf32>
    %2 = tpu.matmul %0, %1, %cst {dimension_numbers = #tpu.dot_dimension_numbers<[1], [0], [0], [1], [0, 0, 1, 1], [], []>} : vector<8x32xbf16>, vector<32x256xbf16>, vector<8x256xf32> -> vector<8x256xf32>
    %c0_3 = arith.constant 0 : index
    %c0_4 = arith.constant 0 : index
    %3 = vector.load %arg3[%c0_3, %c0_4] : memref<1x256xf32, #tpu.memory_space<vmem>>, vector<1x256xf32>
    %4 = vector.broadcast %3 : vector<1x256xf32> to vector<8x256xf32>
    %5 = arith.addf %2, %4 : vector<8x256xf32>
    %cst_5 = arith.constant 0.000000e+00 : f32
    %6 = vector.broadcast %cst_5 : f32 to vector<8x256xf32>
    %7 = arith.maximumf %5, %6 : vector<8x256xf32>
    %8 = vector.extract_strided_slice %7 {offsets = [0, 0], sizes = [8, 128], strides = [1, 1]} : vector<8x256xf32> to vector<8x128xf32>
    %9 = vector.extract_strided_slice %7 {offsets = [0, 128], sizes = [8, 128], strides = [1, 1]} : vector<8x256xf32> to vector<8x128xf32>
    %10 = arith.truncf %8 : vector<8x128xf32> to vector<8x128xbf16>
    %c0_6 = arith.constant 0 : index
    %c0_7 = arith.constant 0 : index
    %11 = vector.load %arg4[%c0_6, %c0_7] : memref<128x128xbf16, #tpu.memory_space<vmem>>, vector<128x128xbf16>
    %cst_8 = arith.constant dense<0.000000e+00> : vector<8x128xf32>
    %12 = tpu.matmul %10, %11, %cst_8 {dimension_numbers = #tpu.dot_dimension_numbers<[1], [0], [0], [1], [0, 0, 1, 1], [], []>} : vector<8x128xbf16>, vector<128x128xbf16>, vector<8x128xf32> -> vector<8x128xf32>
    %c0_9 = arith.constant 0 : index
    %c0_10 = arith.constant 0 : index
    %13 = vector.load %arg5[%c0_9, %c0_10] : memref<1x128xf32, #tpu.memory_space<vmem>>, vector<1x128xf32>
    %14 = vector.broadcast %13 : vector<1x128xf32> to vector<8x128xf32>
    %15 = arith.addf %12, %14 : vector<8x128xf32>
    %cst_11 = arith.constant 0.000000e+00 : f32
    %16 = vector.broadcast %cst_11 : f32 to vector<8x128xf32>
    %17 = arith.maximumf %15, %16 : vector<8x128xf32>
    %18 = arith.truncf %17 : vector<8x128xf32> to vector<8x128xbf16>
    %c0_12 = arith.constant 0 : index
    %c0_13 = arith.constant 0 : index
    %19 = vector.load %arg6[%c0_12, %c0_13] : memref<128x128xbf16, #tpu.memory_space<vmem>>, vector<128x128xbf16>
    %cst_14 = arith.constant dense<0.000000e+00> : vector<8x128xf32>
    %20 = tpu.matmul %18, %19, %cst_14 {dimension_numbers = #tpu.dot_dimension_numbers<[1], [0], [0], [1], [0, 0, 1, 1], [], []>} : vector<8x128xbf16>, vector<128x128xbf16>, vector<8x128xf32> -> vector<8x128xf32>
    %c0_15 = arith.constant 0 : index
    %c0_16 = arith.constant 0 : index
    %21 = vector.load %arg7[%c0_15, %c0_16] : memref<1x128xf32, #tpu.memory_space<vmem>>, vector<1x128xf32>
    %22 = vector.broadcast %21 : vector<1x128xf32> to vector<8x128xf32>
    %23 = arith.addf %20, %22 : vector<8x128xf32>
    %24 = arith.truncf %9 : vector<8x128xf32> to vector<8x128xbf16>
    %c0_17 = arith.constant 0 : index
    %c0_18 = arith.constant 0 : index
    %25 = vector.load %arg8[%c0_17, %c0_18] : memref<128x128xbf16, #tpu.memory_space<vmem>>, vector<128x128xbf16>
    %cst_19 = arith.constant dense<0.000000e+00> : vector<8x128xf32>
    %26 = tpu.matmul %24, %25, %cst_19 {dimension_numbers = #tpu.dot_dimension_numbers<[1], [0], [0], [1], [0, 0, 1, 1], [], []>} : vector<8x128xbf16>, vector<128x128xbf16>, vector<8x128xf32> -> vector<8x128xf32>
    %c0_20 = arith.constant 0 : index
    %c0_21 = arith.constant 0 : index
    %27 = vector.load %arg9[%c0_20, %c0_21] : memref<1x128xf32, #tpu.memory_space<vmem>>, vector<1x128xf32>
    %28 = vector.broadcast %27 : vector<1x128xf32> to vector<8x128xf32>
    %29 = arith.addf %26, %28 : vector<8x128xf32>
    %cst_22 = arith.constant 0.000000e+00 : f32
    %30 = vector.broadcast %cst_22 : f32 to vector<8x128xf32>
    %31 = arith.maximumf %29, %30 : vector<8x128xf32>
    %32 = arith.truncf %31 : vector<8x128xf32> to vector<8x128xbf16>
    %c0_23 = arith.constant 0 : index
    %c0_24 = arith.constant 0 : index
    %33 = vector.load %arg10[%c0_23, %c0_24] : memref<128x128xbf16, #tpu.memory_space<vmem>>, vector<128x128xbf16>
    %cst_25 = arith.constant dense<0.000000e+00> : vector<8x128xf32>
    %34 = tpu.matmul %32, %33, %cst_25 {dimension_numbers = #tpu.dot_dimension_numbers<[1], [0], [0], [1], [0, 0, 1, 1], [], []>} : vector<8x128xbf16>, vector<128x128xbf16>, vector<8x128xf32> -> vector<8x128xf32>
    %c0_26 = arith.constant 0 : index
    %c0_27 = arith.constant 0 : index
    %35 = vector.load %arg11[%c0_26, %c0_27] : memref<1x128xf32, #tpu.memory_space<vmem>>, vector<1x128xf32>
    %36 = vector.broadcast %35 : vector<1x128xf32> to vector<8x128xf32>
    %37 = arith.addf %34, %36 : vector<8x128xf32>
    %38 = tpu.iota {dimensions = array<i32: 1>} : vector<8x128xi32>
    %c16_i32 = arith.constant 16 : i32
    %39 = vector.broadcast %c16_i32 : i32 to vector<8x128xi32>
    %40 = arith.cmpi sge, %38, %39 : vector<8x128xi32>
    %c32_i32 = arith.constant 32 : i32
    %41 = vector.broadcast %c32_i32 : i32 to vector<8x128xi32>
    %42 = arith.cmpi slt, %38, %41 : vector<8x128xi32>
    %43 = arith.andi %40, %42 : vector<8x128xi1>
    %cst_28 = arith.constant 0xFF800000 : f32
    %44 = vector.broadcast %cst_28 : f32 to vector<8x128xf32>
    %45 = arith.select %43, %37, %44 : vector<8x128xi1>, vector<8x128xf32>
    %cst_29 = arith.constant dense<0xFF800000> : vector<8xf32>
    %46 = vector.multi_reduction <maximumf>, %45, %cst_29 [1] : vector<8x128xf32> to vector<8xf32>
    %47 = vector.shape_cast %46 : vector<8xf32> to vector<8x1xf32>
    %48 = vector.broadcast %47 : vector<8x1xf32> to vector<8x128xf32>
    %49 = arith.subf %37, %48 : vector<8x128xf32>
    %cst_30 = arith.constant 0xFF800000 : f32
    %50 = vector.broadcast %cst_30 : f32 to vector<8x128xf32>
    %51 = arith.select %43, %49, %50 : vector<8x128xi1>, vector<8x128xf32>
    %52 = math.exp %51 : vector<8x128xf32>
    %cst_31 = arith.constant dense<0.000000e+00> : vector<8xf32>
    %53 = vector.multi_reduction <add>, %52, %cst_31 [1] : vector<8x128xf32> to vector<8xf32>
    %54 = vector.shape_cast %53 : vector<8xf32> to vector<8x1xf32>
    %55 = math.log %54 : vector<8x1xf32>
    %56 = vector.broadcast %55 : vector<8x1xf32> to vector<8x128xf32>
    %57 = arith.subf %49, %56 : vector<8x128xf32>
    %c16_i32_32 = arith.constant 16 : i32
    %58 = vector.broadcast %c16_i32_32 : i32 to vector<8x128xi32>
    %59 = arith.cmpi slt, %38, %58 : vector<8x128xi32>
    %c32_i32_33 = arith.constant 32 : i32
    %60 = vector.broadcast %c32_i32_33 : i32 to vector<8x128xi32>
    %61 = arith.cmpi slt, %38, %60 : vector<8x128xi32>
    %62 = arith.select %61, %57, %37 : vector<8x128xi1>, vector<8x128xf32>
    %63 = arith.select %59, %23, %62 : vector<8x128xi1>, vector<8x128xf32>
    %c0_34 = arith.constant 0 : index
    %c0_35 = arith.constant 0 : index
    %64 = vector.load %arg12[%c0_34, %c0_35] : memref<8x128xf32, #tpu.memory_space<vmem>>, vector<8x128xf32>
    tpu.vector_store %arg12[%c0_34, %c0_35], %63 {strides = array<i32>} : memref<8x128xf32, #tpu.memory_space<vmem>>, vector<8x128xf32>,
    return
  }
  func.func @transform_0(%arg0: i32) -> (i32, i32) {
    %c0_i32 = arith.constant 0 : i32
    %c0_i32_0 = arith.constant 0 : i32
    return %arg0, %c0_i32 : i32, i32
  }
  func.func @transform_1(%arg0: i32) -> (i32, i32) {
    %c0_i32 = arith.constant 0 : i32
    %c0_i32_0 = arith.constant 0 : i32
    %c0_i32_1 = arith.constant 0 : i32
    return %c0_i32, %c0_i32_0 : i32, i32
  }
  func.func @transform_2(%arg0: i32) -> (i32, i32) {
    %c0_i32 = arith.constant 0 : i32
    %c0_i32_0 = arith.constant 0 : i32
    %c0_i32_1 = arith.constant 0 : i32
    return %c0_i32, %c0_i32_0 : i32, i32
  }
  func.func @transform_3(%arg0: i32) -> (i32, i32) {
    %c0_i32 = arith.constant 0 : i32
    %c0_i32_0 = arith.constant 0 : i32
    %c0_i32_1 = arith.constant 0 : i32
    return %c0_i32, %c0_i32_0 : i32, i32
  }
  func.func @transform_4(%arg0: i32) -> (i32, i32) {
    %c0_i32 = arith.constant 0 : i32
    %c0_i32_0 = arith.constant 0 : i32
    %c0_i32_1 = arith.constant 0 : i32
    return %c0_i32, %c0_i32_0 : i32, i32
  }
  func.func @transform_5(%arg0: i32) -> (i32, i32) {
    %c0_i32 = arith.constant 0 : i32
    %c0_i32_0 = arith.constant 0 : i32
    %c0_i32_1 = arith.constant 0 : i32
    return %c0_i32, %c0_i32_0 : i32, i32
  }
  func.func @transform_6(%arg0: i32) -> (i32, i32) {
    %c0_i32 = arith.constant 0 : i32
    %c0_i32_0 = arith.constant 0 : i32
    %c0_i32_1 = arith.constant 0 : i32
    return %c0_i32, %c0_i32_0 : i32, i32
  }
  func.func @transform_7(%arg0: i32) -> (i32, i32) {
    %c0_i32 = arith.constant 0 : i32
    %c0_i32_0 = arith.constant 0 : i32
    %c0_i32_1 = arith.constant 0 : i32
    return %c0_i32, %c0_i32_0 : i32, i32
  }
  func.func @transform_8(%arg0: i32) -> (i32, i32) {
    %c0_i32 = arith.constant 0 : i32
    %c0_i32_0 = arith.constant 0 : i32
    %c0_i32_1 = arith.constant 0 : i32
    return %c0_i32, %c0_i32_0 : i32, i32
  }
  func.func @transform_9(%arg0: i32) -> (i32, i32) {
    %c0_i32 = arith.constant 0 : i32
    %c0_i32_0 = arith.constant 0 : i32
    %c0_i32_1 = arith.constant 0 : i32
    return %c0_i32, %c0_i32_0 : i32, i32
  }
  func.func @transform_10(%arg0: i32) -> (i32, i32) {
    %c0_i32 = arith.constant 0 : i32
    %c0_i32_0 = arith.constant 0 : i32
    %c0_i32_1 = arith.constant 0 : i32
    return %c0_i32, %c0_i32_0 : i32, i32
  }
  func.func @transform_11(%arg0: i32) -> (i32, i32) {
    %c0_i32 = arith.constant 0 : i32
    %c0_i32_0 = arith.constant 0 : i32
    return %arg0, %c0_i32 : i32, i32
  }
}

</mosaic_0001>

<bundles_post_ra>
// kernel: behavior_q_network_forward.1
= control target key start
LH: loop header
LB: loop body
LE: loop exit
PB: predicated region body
PF: predicated region fallthrough
CT: control target
= control target key end

     0   :  { %16 = vsyncpa [#allocation3], 0  ;;  %s1362_s0 = inlined_call_operand.vmem [shape: bf16[8,32], index: 0, kind: input, shape index: {}]   ;;  %s1363_s1 = inlined_call_operand.vmem [shape: bf16[32,256], index: 1, kind: input, shape index: {}]   ;;  %s1364_s2 = inlined_call_operand.vmem [shape: f32[1,256], index: 2, kind: input, shape index: {}]   ;;  %s1365_s3 = inlined_call_operand.hbm [shape: bf16[128,128], index: 3, kind: input, shape index: {}]   ;;  %s1366_s4 = inlined_call_operand.hbm [shape: f32[1,128], index: 4, kind: input, shape index: {}]   ;;  %s1367_s5 = inlined_call_operand.hbm [shape: bf16[128,128], index: 5, kind: input, shape index: {}]   ;;  %s1368_s6 = inlined_call_operand.hbm [shape: f32[1,128], index: 6, kind: input, shape index: {}]   ;;  %s1369_s7 = inlined_call_operand.hbm [shape: bf16[128,128], index: 7, kind: input, shape index: {}]   ;;  %s1370_s8 = inlined_call_operand.hbm [shape: f32[1,128], index: 8, kind: input, shape index: {}]   ;;  %s1371_s9 = inlined_call_operand.hbm [shape: bf16[128,128], index: 9, kind: input, shape index: {}]   ;;  %s1372_s10 = inlined_call_operand.hbm [shape: f32[1,128], index: 10, kind: input, shape index: {}]   ;;  %s1373_s11 = inlined_call_operand.vmem [shape: f32[8,128], index: 11, kind: output, shape index: {}]  }
   0x1   :  { %17 = vsyncpa [#allocation5], 0 }
   0x2   :  { %18 = vsyncpa [#allocation8], 0 }
   0x3   :  { %19 = vsyncpa [#allocation11], 0 }
   0x4   :  { %20 = vsyncpa [#allocation14], 0  ;;  %s1102_s17 = smov [#allocation4]   ;;  %s1103_s19 = smov [#allocation7]  }
   0x5   :  { %s45_s18 = sshll.u32 %s1102_s17, 4  ;;  %s67_s20 = sshll.u32 %s1103_s19, 4  ;;  %s46_s18 = int_to_ptr.vmem [resolvable:$true] %s45_s18  ;;  %s68_s20 = int_to_ptr.vmem [resolvable:$true] %s67_s20 }
   0x6   :  { %s916_s23 = scalar_lea.hbm %s1366_s4, 16 }
   0x7   :  { %p917_p0 = scmp.ne.s32.totalorder %s1366_s4, %s916_s23  ;;  %p920_p1 = scmp.lt.u32.totalorder %s916_s23, %s1366_s4 }
   0x9   :  { %p922_p2 = pnand %p920_p1, %p917_p0 }
   0xb   :  { %925 = shalt.err (!%p922_p2)
}
   0xc   :  { %s926_s28 = scalar_lea.vmem %s46_s18, 16  ;;  %s930_s29 = scalar_lea.vmem %s46_s18, 32 }
   0xd   :  { %p927_p3 = scmp.ne.s32.totalorder %s46_s18, %s926_s28  ;;  %p931_p4 = scmp.lt.s32.totalorder %s46_s18, %s46_s18 }
   0xe   :  { %p932_p5 = scmp.lt.s32.totalorder %s930_s29, %s926_s28 }
  0x10   :  { %p933_p6 = por %p932_p5, %p931_p4 }
  0x12   :  { %p934_p7 = pnand %p933_p6, %p927_p3 }
  0x14   :  { %937 = shalt.err (!%p934_p7)
}
  0x15   :  { %48 = dma.hbm_to_vmem [thread:$0]  %s1366_s4, 16, %s46_s18, [#allocation5]  }
  0x16   :  { %s938_s15 = scalar_lea.hbm %s1368_s6, 16 }
  0x17   :  { %p939_p8 = scmp.ne.s32.totalorder %s1368_s6, %s938_s15  ;;  %p942_p9 = scmp.lt.u32.totalorder %s938_s15, %s1368_s6 }
  0x19   :  { %p944_p10 = pnand %p942_p9, %p939_p8 }
  0x1b   :  { %947 = shalt.err (!%p944_p10)
}
  0x1c   :  { %s948_s22 = scalar_lea.vmem %s68_s20, 16  ;;  %s952_s23 = scalar_lea.vmem %s68_s20, 32 }
  0x1d   :  { %p949_p11 = scmp.ne.s32.totalorder %s68_s20, %s948_s22  ;;  %p953_p12 = scmp.lt.s32.totalorder %s68_s20, %s68_s20 }
  0x1e   :  { %p954_p13 = scmp.lt.s32.totalorder %s952_s23, %s948_s22 }
  0x20   :  { %p955_p0 = por %p954_p13, %p953_p12 }
  0x22   :  { %p956_p1 = pnand %p955_p0, %p949_p11 }
  0x24   :  { %959 = shalt.err (!%p956_p1)
}
  0x25   :  { %70 = dma.hbm_to_vmem [thread:$0]  %s1368_s6, 16, %s68_s20, [#allocation8]  }
  0x26   :  { %s1104_s24 = smov [#allocation10]   ;;  %s1105_s26 = smov [#allocation2]  }
  0x27   :  { %s89_s25 = sshll.u32 %s1104_s24, 4  ;;  %s32_s27 = sshll.u32 %s1105_s26, 4  ;;  %s90_s25 = int_to_ptr.vmem [resolvable:$true] %s89_s25  ;;  %s1199_s27 = int_to_ptr.vmem [resolvable:$true] %s32_s27 }
  0x28   :  { %s960_s30 = scalar_lea.hbm %s1370_s8, 16 }
  0x29   :  { %p961_p2 = scmp.ne.s32.totalorder %s1370_s8, %s960_s30  ;;  %p964_p3 = scmp.lt.u32.totalorder %s960_s30, %s1370_s8 }
  0x2b   :  { %p966_p4 = pnand %p964_p3, %p961_p2 }
  0x2d   :  { %969 = shalt.err (!%p966_p4)
}
  0x2e   :  { %s970_s6 = scalar_lea.vmem %s90_s25, 16  ;;  %s974_s20 = scalar_lea.vmem %s90_s25, 32 }
  0x2f   :  { %p971_p5 = scmp.ne.s32.totalorder %s90_s25, %s970_s6  ;;  %p975_p6 = scmp.lt.s32.totalorder %s90_s25, %s90_s25 }
  0x30   :  { %p976_p7 = scmp.lt.s32.totalorder %s974_s20, %s970_s6 }
  0x32   :  { %p977_p8 = por %p976_p7, %p975_p6 }
  0x34   :  { %p978_p9 = pnand %p977_p8, %p971_p5 }
  0x36   :  { %981 = shalt.err (!%p978_p9)
}
  0x37   :  { %92 = dma.hbm_to_vmem [thread:$0]  %s1370_s8, 16, %s90_s25, [#allocation11]  }
  0x38   :  { %s982_s22 = scalar_lea.hbm %s1365_s3, 1024 }
  0x39   :  { %p983_p10 = scmp.ne.s32.totalorder %s1365_s3, %s982_s22  ;;  %p986_p11 = scmp.lt.u32.totalorder %s982_s22, %s1365_s3 }
  0x3b   :  { %p988_p12 = pnand %p986_p11, %p983_p10 }
  0x3d   :  { %991 = shalt.err (!%p988_p12)
}
  0x3e   :  { %s992_s26 = scalar_lea.vmem %s1199_s27, 1024  ;;  %p997_p0 = scmp.lt.s32.totalorder %s1199_s27, %s1199_s27 }
  0x3f   :  { %p993_p13 = scmp.ne.s32.totalorder %s1199_s27, %s992_s26  ;;  %p998_p1 = scmp.lt.s32.totalorder %s992_s26, %s992_s26 }
  0x41   :  { %p999_p2 = por %p998_p1, %p997_p0 }
  0x43   :  { %p1000_p3 = pnand %p999_p2, %p993_p13 }
  0x45   :  { %1003 = shalt.err (!%p1000_p3)
}
  0x46   :  { %s1106_s8 = smov 64   ;;  %s1107_s25 = smov 4  }
  0x47   :  { %38 = dma.hbm_to_vmem [thread:$0]  %s1365_s3, 1024, %s1199_s27, [#allocation3], %s1106_s8, %s1106_s8, %s1107_s25  }
  0x48   :  { %s1108_s30 = smov [#allocation6]   ;;  %s1109_s13 = smov [#allocation9]  }
  0x49   :  { %s54_s12 = sshll.u32 %s1108_s30, 4  ;;  %s76_s14 = sshll.u32 %s1109_s13, 4  ;;  %s55_s12 = int_to_ptr.vmem [resolvable:$true] %s54_s12  ;;  %s1233_s14 = int_to_ptr.vmem [resolvable:$true] %s76_s14 }
  0x4a   :  { %s1004_s20 = scalar_lea.hbm %s1367_s5, 1024 }
  0x4b   :  { %p1005_p4 = scmp.ne.s32.totalorder %s1367_s5, %s1004_s20  ;;  %p1008_p5 = scmp.lt.u32.totalorder %s1004_s20, %s1367_s5 }
  0x4d   :  { %p1010_p6 = pnand %p1008_p5, %p1005_p4 }
  0x4f   :  { %1013 = shalt.err (!%p1010_p6)
}
  0x50   :  { %s1014_s3 = scalar_lea.vmem %s55_s12, 1024  ;;  %p1019_p8 = scmp.lt.s32.totalorder %s55_s12, %s55_s12 }
  0x51   :  { %p1015_p7 = scmp.ne.s32.totalorder %s55_s12, %s1014_s3  ;;  %p1020_p9 = scmp.lt.s32.totalorder %s1014_s3, %s1014_s3 }
  0x53   :  { %p1021_p10 = por %p1020_p9, %p1019_p8 }
  0x55   :  { %p1022_p11 = pnand %p1021_p10, %p1015_p7 }
  0x57   :  { %1025 = shalt.err (!%p1022_p11)
}
  0x58   :  { %60 = dma.hbm_to_vmem [thread:$0]  %s1367_s5, 1024, %s55_s12, [#allocation5], %s1106_s8, %s1106_s8, %s1107_s25  }
  0x59   :  { %s1026_s18 = scalar_lea.hbm %s1369_s7, 1024 }
  0x5a   :  { %p1027_p12 = scmp.ne.s32.totalorder %s1369_s7, %s1026_s18  ;;  %p1030_p13 = scmp.lt.u32.totalorder %s1026_s18, %s1369_s7 }
  0x5c   :  { %p1032_p0 = pnand %p1030_p13, %p1027_p12 }
  0x5e   :  { %1035 = shalt.err (!%p1032_p0)
}
  0x5f   :  { %s1036_s30 = scalar_lea.vmem %s1233_s14, 1024  ;;  %p1041_p2 = scmp.lt.s32.totalorder %s1233_s14, %s1233_s14 }
  0x60   :  { %p1037_p1 = scmp.ne.s32.totalorder %s1233_s14, %s1036_s30  ;;  %p1042_p3 = scmp.lt.s32.totalorder %s1036_s30, %s1036_s30 }
  0x62   :  { %p1043_p4 = por %p1042_p3, %p1041_p2 }
  0x64   :  { %p1044_p5 = pnand %p1043_p4, %p1037_p1 }
  0x66   :  { %1047 = shalt.err (!%p1044_p5)
}
  0x67   :  { %82 = dma.hbm_to_vmem [thread:$0]  %s1369_s7, 1024, %s1233_s14, [#allocation8], %s1106_s8, %s1106_s8, %s1107_s25  }
  0x68   :  { %s1110_s13 = smov [#allocation12]   ;;  %s1111_s6 = smov [#allocation13]  }
  0x69   :  { %s98_s15 = sshll.u32 %s1110_s13, 4  ;;  %s111_s20 = sshll.u32 %s1111_s6, 4  ;;  %s99_s15 = int_to_ptr.vmem [resolvable:$true] %s98_s15  ;;  %s112_s20 = int_to_ptr.vmem [resolvable:$true] %s111_s20 }
  0x6a   :  { %s1048_s19 = scalar_lea.hbm %s1371_s9, 1024 }
  0x6b   :  { %p1049_p6 = scmp.ne.s32.totalorder %s1371_s9, %s1048_s19  ;;  %p1052_p7 = scmp.lt.u32.totalorder %s1048_s19, %s1371_s9 }
  0x6d   :  { %p1054_p8 = pnand %p1052_p7, %p1049_p6 }
  0x6f   :  { %1057 = shalt.err (!%p1054_p8)
}
  0x70   :  { %s1058_s7 = scalar_lea.vmem %s99_s15, 1024  ;;  %p1063_p10 = scmp.lt.s32.totalorder %s99_s15, %s99_s15 }
  0x71   :  { %p1059_p9 = scmp.ne.s32.totalorder %s99_s15, %s1058_s7  ;;  %p1064_p11 = scmp.lt.s32.totalorder %s1058_s7, %s1058_s7 }
  0x73   :  { %p1065_p12 = por %p1064_p11, %p1063_p10 }
  0x75   :  { %p1066_p13 = pnand %p1065_p12, %p1059_p9 }
  0x77   :  { %1069 = shalt.err (!%p1066_p13)
}
  0x78   :  { %104 = dma.hbm_to_vmem [thread:$0]  %s1371_s9, 1024, %s99_s15, [#allocation11], %s1106_s8, %s1106_s8, %s1107_s25  }
  0x79   :  { %s1070_s24 = scalar_lea.hbm %s1372_s10, 16 }
  0x7a   :  { %p1071_p0 = scmp.ne.s32.totalorder %s1372_s10, %s1070_s24  ;;  %p1074_p1 = scmp.lt.u32.totalorder %s1070_s24, %s1372_s10 }
  0x7c   :  { %p1076_p2 = pnand %p1074_p1, %p1071_p0 }
  0x7e   :  { %1079 = shalt.err (!%p1076_p2)
}
  0x7f   :  { %s1080_s5 = scalar_lea.vmem %s112_s20, 16  ;;  %s1084_s12 = scalar_lea.vmem %s112_s20, 32 }
  0x80   :  { %p1081_p3 = scmp.ne.s32.totalorder %s112_s20, %s1080_s5  ;;  %p1085_p4 = scmp.lt.s32.totalorder %s112_s20, %s112_s20 }
  0x81   :  { %p1086_p5 = scmp.lt.s32.totalorder %s1084_s12, %s1080_s5 }
  0x83   :  { %p1087_p6 = por %p1086_p5, %p1085_p4 }
  0x85   :  { %p1088_p7 = pnand %p1087_p6, %p1081_p3 }
  0x87   :  { %1091 = shalt.err (!%p1088_p7)
}
  0x88   :  { %114 = dma.hbm_to_vmem [thread:$0]  %s1372_s10, 16, %s112_s20, [#allocation14]  }
  0x89   :  { %1092 = dma.done.wait [#allocation3], 1024  }
  0x8a   :  { %1093 = vsyncadd [#allocation3], 4294966272 }
  0x8b   :  { %1094 = dma.done.wait [#allocation5], 1040  }
  0x8c   :  { %1095 = vsyncadd [#allocation5], 4294966256 }
  0x8d   :  { %1096 = dma.done.wait [#allocation8], 1040  }
  0x8e   :  { %1097 = vsyncadd [#allocation8], 4294966256 }
  0x8f   :  { %1098 = dma.done.wait [#allocation11], 1040  }
  0x90   :  { %1099 = vsyncadd [#allocation11], 4294966256 }
  0x91   :  { %1100 = dma.done.wait [#allocation14], 16  }
  0x92   :  { %1101 = vsyncadd [#allocation14], 4294967280  ;;  %v1112_v0 = vmov 0   ;;  %v1113_v1 = vmov 0.0   ;;  %v874_v2 = vld [vmem:[%s1363_s1 + $0x4] ss:$8 sps:$4 sm:$0xff]   ;;  %v147_v22 = vlaneseq }
  0x93   :  { %213 = vmatprep.mubr.bf16.mxu0 %v1112_v0  ;;  %781 = vmatprep.subr.bf16.mxu1 %v1113_v1  ;;  %v876_v3 = vld [vmem:[%s1363_s1] ss:$8 sps:$4 sm:$0xff]   ;;  %v877_v4 = vld [vmem:[%s1363_s1 + $0x14] ss:$8 sps:$4 sm:$0xff]   ;;  %v879_v5 = vld [vmem:[%s1363_s1 + $0x10] ss:$8 sps:$4 sm:$0xff]  }
  0x94   :  { %181 = vmatprep.subr.bf16.mxu0 %v874_v2  ;;  %v880_v6 = vld [vmem:[#allocation2] sm:$0xff]   ;;  %v881_v7 = vld [vmem:[#allocation2 + $0x8] sm:$0xff]   ;;  %vm177_vm0 = vcmask 261120   ;;  %v882_v9 = vld [vmem:[#allocation2 + $0x10] sm:$0xff]   ;;  %vm1114_vm1 = vmmov 0   ;;  %v148_v23 = vshrl.u32 %v147_v22, 7 }
  0x95   :  { %182 = vmatpush1.bf16.msra.mxu0 %v876_v3  ;;  %782 = vmatpush3.bf16.msra.mxu1 %v880_v6  ;;  %v140_v8 = vld [vmem:[%s1362_s0] sm:$0xf]  ;;  %v883_v10 = vld [vmem:[#allocation2 + $0x18] sm:$0xff]   ;;  %v885_v12 = vld [vmem:[#allocation2 + $0x28] sm:$0xff]  }
  0x96   :  { %183 = vmatprep.subr.bf16.mxu0 %v877_v4  ;;  %783 = vmatprep.subr.bf16.mxu1 %v1113_v1  ;;  %v884_v11 = vld [vmem:[#allocation2 + $0x20] sm:$0xff]   ;;  %v886_v13 = vld [vmem:[#allocation2 + $0x30] sm:$0xff]   ;;  %v887_v14 = vld [vmem:[#allocation2 + $0x38] sm:$0xff]   ;;  %v149_v24 = vsub.s32 0, %v148_v23  ;;  %v153_v39 = vsub.s32 1, %v148_v23 }
  0x97   :  { %797 = vmatprep.mubr.msk.bf16.mxu1 %vm1114_vm1, %v1113_v1  ;;  %v896_v15 = vld [vmem:[#allocation6] sm:$0xff]   ;;  %v897_v16 = vld [vmem:[#allocation6 + $0x8] sm:$0xff]   ;;  %v898_v17 = vld [vmem:[#allocation6 + $0x10] sm:$0xff]  }
  0x98   :  { %v899_v18 = vld [vmem:[#allocation6 + $0x18] sm:$0xff]   ;;  %v900_v19 = vld [vmem:[#allocation6 + $0x20] sm:$0xff]   ;;  %v901_v20 = vld [vmem:[#allocation6 + $0x28] sm:$0xff]  }
  0x99   :  { %184 = vmatpush1.bf16.msra.mxu0 %v879_v5  ;;  %784 = vmatpush3.bf16.msra.mxu1 %v881_v7  ;;  %v902_v21 = vld [vmem:[#allocation6 + $0x30] sm:$0xff]   ;;  %v145_v25 = vld [vmem:[%s1364_s2] sm:$0x3]  ;;  %v888_v33 = vld [vmem:[#allocation9] sm:$0xff]  }
  0x9a   :  { %801 = vmatprep.subr.bf16.mxu0 %v1113_v1  ;;  %785 = vmatprep.subr.bf16.mxu1 %v1113_v1  ;;  %v150_v26 = vrot.slane %v145_v25, %v149_v24  ;;  %v889_v35 = vld [vmem:[#allocation9 + $0x8] sm:$0xff]   ;;  %v890_v36 = vld [vmem:[#allocation9 + $0x10] sm:$0xff]   ;;  %v891_v37 = vld [vmem:[#allocation9 + $0x18] sm:$0xff]   ;;  %v154_v41 = vrot.slane %v145_v25, %v153_v39 }
  0x9b   :  { %v892_v38 = vld [vmem:[#allocation9 + $0x20] sm:$0xff]   ;;  %v893_v40 = vld [vmem:[#allocation9 + $0x28] sm:$0xff]   ;;  %v894_v42 = vld [vmem:[#allocation9 + $0x30] sm:$0xff]  }
  0x9c   :  { %708 = vmatmul.mubr.msk.bf16.vlgmr.msra.gmra.mrb[0].mxu0 %vm177_vm0, %v140_v8  ;;  %v895_v44 = vld [vmem:[#allocation9 + $0x38] sm:$0xff]   ;;  %v904_v55 = vld [vmem:[#allocation12] sm:$0xff]   ;;  %v905_v57 = vld [vmem:[#allocation12 + $0x8] sm:$0xff]  }
  0x9d   :  { %786 = vmatpush3.bf16.msra.mxu1 %v882_v9  ;;  %817 = vmatprep.mubr.msk.bf16.mxu0 %vm1114_vm1, %v1113_v1  ;;  %v903_v47 = vld [vmem:[#allocation6 + $0x38] sm:$0xff]   ;;  %v908_v60 = vld [vmem:[#allocation12 + $0x20] sm:$0xff]   ;;  %v909_v61 = vld [vmem:[#allocation12 + $0x28] sm:$0xff]  }
  0x9e   :  { %787 = vmatprep.subr.bf16.mxu1 %v1113_v1  ;;  %802 = vmatpush3.bf16.msra.mxu0 %v896_v15  ;;  %v709_v48 = vld [vmem:[#allocation4] ss:$0 sm:$0xff]  ;;  %v906_v58 = vld [vmem:[#allocation12 + $0x10] sm:$0xff]   ;;  %v727_v63 = vld [vmem:[#allocation10] ss:$0 sm:$0xff] }
  0x9f   :  { %803 = vmatprep.subr.bf16.mxu0 %v1113_v1  ;;  %v907_v59 = vld [vmem:[#allocation12 + $0x18] sm:$0xff]   ;;  %v910_v62 = vld [vmem:[#allocation12 + $0x30] sm:$0xff]  }
  0xa0   :  { %v911_v2 = vld [vmem:[#allocation12 + $0x38] sm:$0xff]  }
  0xa1   :  { %788 = vmatpush3.bf16.msra.mxu1 %v883_v10 }
  0xa2   :  { %789 = vmatprep.subr.bf16.mxu1 %v1113_v1  ;;  %804 = vmatpush3.bf16.msra.mxu0 %v897_v16 }
  0xa3   :  { %805 = vmatprep.subr.bf16.mxu0 %v1113_v1 }
  0xa5   :  { %790 = vmatpush3.bf16.msra.mxu1 %v884_v11 }
  0xa6   :  { %791 = vmatprep.subr.bf16.mxu1 %v1113_v1  ;;  %806 = vmatpush3.bf16.msra.mxu0 %v898_v17 }
  0xa7   :  { %807 = vmatprep.subr.bf16.mxu0 %v1113_v1 }
  0xa9   :  { %792 = vmatpush3.bf16.msra.mxu1 %v885_v12 }
  0xaa   :  { %793 = vmatprep.subr.bf16.mxu1 %v1113_v1  ;;  %808 = vmatpush3.bf16.msra.mxu0 %v899_v18 }
  0xab   :  { %809 = vmatprep.subr.bf16.mxu0 %v1113_v1 }
  0xad   :  { %794 = vmatpush3.bf16.msra.mxu1 %v886_v13  ;;  %v675_v13 = vand.u32 127, %v147_v22 }
  0xae   :  { %795 = vmatprep.subr.bf16.mxu1 %v1113_v1  ;;  %810 = vmatpush3.bf16.msra.mxu0 %v900_v19 }
  0xaf   :  { %811 = vmatprep.subr.bf16.mxu0 %v1113_v1  ;;  %vm676_vm2 = vcmp.ge.s32.totalorder %v675_v13, 16  ;;  %vm677_vm3 = vcmp.lt.s32.totalorder %v675_v13, 32  ;;  %vm691_vm5 = vcmp.lt.s32.totalorder %v675_v13, 16 }
  0xb0   :  { %vm678_vm4 = vmand %vm676_vm2, %vm677_vm3 }
  0xb1   :  { %796 = vmatpush3.bf16.msra.mxu1 %v887_v14  ;;  %v736_v14 = vld [vmem:[#allocation13] ss:$0 sm:$0xff] }
  0xb2   :  { %821 = vmatprep.subr.bf16.mxu1 %v1113_v1  ;;  %812 = vmatpush3.bf16.msra.mxu0 %v901_v20 }
  0xb3   :  { %813 = vmatprep.subr.bf16.mxu0 %v1113_v1 }
  0xb6   :  { %814 = vmatpush3.bf16.msra.mxu0 %v902_v21 }
  0xb7   :  { %815 = vmatprep.subr.bf16.mxu0 %v1113_v1 }
  0xba   :  { %816 = vmatpush3.bf16.msra.mxu0 %v903_v47 }
  0xbb   :  { %841 = vmatprep.subr.bf16.mxu0 %v1113_v1 }
 0x16f   :  { %v215_v27 = vpop.f32.mrb[0].mxu0 }
 0x170   :  { %v216_v28 = vadd.f32 %v215_v27, %v150_v26  ;;  %v217_v29 = vpop.f32.mrb[1].mxu0  ;;  %v718_v27 = vld [vmem:[#allocation7] ss:$0 sm:$0xff] }
 0x171   :  { %v219_v30 = vpop.f32.mrb[2].mxu0  ;;  %v218_v43 = vadd.f32 %v217_v29, %v154_v41 }
 0x172   :  { %v222_v31 = vmax.f32 %v216_v28, 0.0  ;;  %v220_v32 = vpop.f32.mrb[3].mxu0 }
 0x173   :  { %v223_v45 = vmax.f32 %v218_v43, 0.0 }
 0x174   :  { %v224_v34 = vpack.c.bf16 %v222_v31, %v222_v31 }
 0x175   :  { %v449_v46 = vpack.c.bf16 %v223_v45, %v223_v45 }
 0x176   :  { %798 = vmatmul.mubr.bf16.vlgmr.msra.gmra.mrb[0].mxu1 %v224_v34 }
 0x177   :  { %822 = vmatpush3.bf16.msra.mxu1 %v888_v33  ;;  %837 = vmatprep.mubr.msk.bf16.mxu1 %vm1114_vm1, %v1113_v1 }
 0x178   :  { %823 = vmatprep.subr.bf16.mxu1 %v1113_v1 }
 0x17b   :  { %824 = vmatpush3.bf16.msra.mxu1 %v889_v35 }
 0x17c   :  { %825 = vmatprep.subr.bf16.mxu1 %v1113_v1 }
 0x17f   :  { %826 = vmatpush3.bf16.msra.mxu1 %v890_v36 }
 0x180   :  { %827 = vmatprep.subr.bf16.mxu1 %v1113_v1 }
 0x183   :  { %828 = vmatpush3.bf16.msra.mxu1 %v891_v37 }
 0x184   :  { %829 = vmatprep.subr.bf16.mxu1 %v1113_v1 }
 0x187   :  { %830 = vmatpush3.bf16.msra.mxu1 %v892_v38 }
 0x188   :  { %831 = vmatprep.subr.bf16.mxu1 %v1113_v1 }
 0x18b   :  { %832 = vmatpush3.bf16.msra.mxu1 %v893_v40 }
 0x18c   :  { %833 = vmatprep.subr.bf16.mxu1 %v1113_v1 }
 0x18f   :  { %834 = vmatpush3.bf16.msra.mxu1 %v894_v42 }
 0x190   :  { %835 = vmatprep.subr.bf16.mxu1 %v1113_v1 }
 0x193   :  { %836 = vmatpush3.bf16.msra.mxu1 %v895_v44 }
 0x196   :  { %838 = vmatmul.mubr.bf16.vlgmr.msra.gmra.mrb[4].mxu1 %v449_v46 }
 0x249   :  { %v330_v49 = vpop.f32.mrb[0].mxu1 }
 0x24a   :  { %v331_v50 = vadd.f32 %v709_v48, %v330_v49  ;;  %v799_v51 = vpop.f32.mrb[1].mxu1 }
 0x24b   :  { %v333_v52 = vpop.f32.mrb[2].mxu1 }
 0x24c   :  { %v336_v53 = vmax.f32 %v331_v50, 0.0  ;;  %v800_v54 = vpop.f32.mrb[3].mxu1 }
 0x24e   :  { %v337_v56 = vpack.c.bf16 %v336_v53, %v336_v53 }
 0x250   :  { %818 = vmatmul.mubr.bf16.vlgmr.msra.gmra.mrb[4].mxu0 %v337_v56 }
 0x251   :  { %842 = vmatpush3.bf16.msra.mxu0 %v904_v55  ;;  %857 = vmatprep.mubr.msk.bf16.mxu0 %vm1114_vm1, %v1113_v1 }
 0x252   :  { %843 = vmatprep.subr.bf16.mxu0 %v1113_v1 }
 0x255   :  { %844 = vmatpush3.bf16.msra.mxu0 %v905_v57 }
 0x256   :  { %845 = vmatprep.subr.bf16.mxu0 %v1113_v1 }
 0x259   :  { %846 = vmatpush3.bf16.msra.mxu0 %v906_v58 }
 0x25a   :  { %847 = vmatprep.subr.bf16.mxu0 %v1113_v1 }
 0x25d   :  { %848 = vmatpush3.bf16.msra.mxu0 %v907_v59 }
 0x25e   :  { %849 = vmatprep.subr.bf16.mxu0 %v1113_v1 }
 0x261   :  { %850 = vmatpush3.bf16.msra.mxu0 %v908_v60 }
 0x262   :  { %851 = vmatprep.subr.bf16.mxu0 %v1113_v1 }
 0x265   :  { %852 = vmatpush3.bf16.msra.mxu0 %v909_v61 }
 0x266   :  { %853 = vmatprep.subr.bf16.mxu0 %v1113_v1 }
 0x269   :  { %v555_v0 = vpop.f32.mrb[4].mxu1  ;;  %854 = vmatpush3.bf16.msra.mxu0 %v910_v62 }
 0x26a   :  { %v556_v3 = vadd.f32 %v727_v63, %v555_v0  ;;  %v839_v4 = vpop.f32.mrb[5].mxu1  ;;  %855 = vmatprep.subr.bf16.mxu0 %v1113_v1 }
 0x26b   :  { %v558_v5 = vpop.f32.mrb[6].mxu1 }
 0x26c   :  { %v561_v6 = vmax.f32 %v556_v3, 0.0  ;;  %v840_v7 = vpop.f32.mrb[7].mxu1 }
 0x26d   :  { %856 = vmatpush3.bf16.msra.mxu0 %v911_v2 }
 0x26e   :  { %v562_v8 = vpack.c.bf16 %v561_v6, %v561_v6 }
 0x270   :  { %858 = vmatmul.mubr.bf16.vlgmr.msra.gmra.mrb[8].mxu0 %v562_v8 }
 0x323   :  { %v443_v9 = vpop.f32.mrb[4].mxu0 }
 0x324   :  { %v819_v10 = vpop.f32.mrb[5].mxu0  ;;  %v444_v30 = vadd.f32 %v718_v27, %v443_v9 }
 0x325   :  { %v446_v11 = vpop.f32.mrb[6].mxu0 }
 0x326   :  { %v820_v12 = vpop.f32.mrb[7].mxu0 }
 0x343   :  { %v668_v15 = vpop.f32.mrb[8].mxu0 }
 0x344   :  { %v669_v16 = vadd.f32 %v736_v14, %v668_v15  ;;  %v859_v1 = vpop.f32.mrb[9].mxu0 }
 0x345   :  { %v671_v17 = vpop.f32.mrb[10].mxu0 }
 0x346   :  { %v860_v18 = vpop.f32.mrb[11].mxu0  ;;  %v679_v19 = vsel %vm678_vm4, %v669_v16, -inf }
 0x347   :  { %680 = vmax.xlane.f32.xlu0 %v679_v19 }
 0x3d4   :  { %v681_v20 = vpop.xlane.xlu0 %680 }
 0x3d5   :  { %v682_v21 = vsub.f32 %v669_v16, %v681_v20 }
 0x3d7   :  { %v683_v23 = vsel %vm678_vm4, %v682_v21, -inf }
 0x3d8   :  { %v684_v24 = vmul.f32 1.442695, %v683_v23 }
 0x3da   :  { %912 = vpow2.f32 %v684_v24 }
 0x3e4   :  { %v913_v25 = vpop.eup %912 }
 0x3e5   :  { %686 = vadd.xlane.f32.xlu0 %v913_v25 }
 0x472   :  { %v687_v22 = vpop.xlane.xlu0 %686 }
 0x473   :  { %914 = vlog2.f32 %v687_v22 }
 0x47d   :  { %v915_v26 = vpop.eup %914 }
 0x47e   :  { %v689_v28 = vmul.f32 0.6931472, %v915_v26 }
 0x480   :  { %v690_v29 = vsub.f32 %v682_v21, %v689_v28 }
 0x482   :  { %v692_v31 = vsel %vm677_vm3, %v690_v29, %v669_v16 }
 0x483   :  { %v693_v32 = vsel %vm691_vm5, %v444_v30, %v692_v31 }
 0x484   :  { %694 = vst [vmem:[%s1373_s11] sm:$0xff] %v693_v32 }
 0x485   :  { %699 = vsyncpa [#allocation3], 1 }
 0x486   :  { %700 = vsyncpa [#allocation5], 1 }
 0x487   :  { %701 = vsyncpa [#allocation8], 1 }
 0x488   :  { %702 = vsyncpa [#allocation11], 1 }
 0x489   :  { %703 = vsyncpa [#allocation14], 1 }

</bundles_post_ra>
